<compile_context>
chip_gen: v5e
topology: v5e:2x2
jax: 0.10.0
libtpu: 0.0.40
codegen_flags: <defaults>
</compile_context>

<pallas_src>
import functools

import jax
import jax.numpy as jnp
from jax.experimental import pallas as pl
from jax.experimental.pallas import tpu as pltpu

_MIB = 1024 * 1024


def _concat_residual_kernel_mxu(x2_ref, w_ref, b_ref, o_ref):
    # x2_ref: (bn, C2, t_hw)  second channel half, H*W on the lane axis
    # w_ref : (C2, C2)        conv weight (out_ch, in_ch); VMEM-resident
    # b_ref : (C2, 1)         conv bias (f32)
    # o_ref : (bn, C2, t_hw)  conv half of the (input-aliased) output
    bn = x2_ref.shape[0]
    w = w_ref[...]
    b = b_ref[...]
    for bi in range(bn):          # static, small; one MXU matmul per batch row
        y = jnp.dot(w, x2_ref[bi], preferred_element_type=jnp.float32)
        o_ref[bi] = (y + b).astype(o_ref.dtype)


def _concat_residual_kernel_vpu(x2_ref, w_ref, b_ref, o_ref):
    # Tiny-C2 fallback: explicit VPU MAC over the C2 input channels; avoids
    # padding a depth-2..8 contraction up to the full MXU systolic array.
    c2 = w_ref.shape[1]
    x2 = x2_ref[...].astype(jnp.float32)      # (bn, C2, t_hw)
    w = w_ref[...].astype(jnp.float32)        # (C2, C2)
    b = b_ref[...].astype(jnp.float32)        # (C2, 1)
    acc = jnp.zeros(o_ref.shape, jnp.float32)
    for i in range(c2):                       # static, < 8 (f32) / < 16 (bf16)
        acc = acc + w[:, i:i + 1][None] * x2[:, i:i + 1, :]
    o_ref[...] = (acc + b[None]).astype(o_ref.dtype)


def _vmem_capacity_bytes():
    try:
        return int(pltpu.get_tpu_info().vmem_capacity_bytes)
    except Exception:
        return 64 * _MIB          # conservative fallback (v7x per-TC VMEM)


def _choose_tiling(N, C2, HW, itemsize, data_budget, force_two_steps):
    """Pick (bn, t_hw).  Pipelined data VMEM per step = 4 * bn * C2 * t_hw * itemsize
    (input + output tiles, each double-buffered)."""
    per_col = 4 * C2 * itemsize            # bytes per unit of (bn * t_hw)
    full_slab = per_col * HW               # bn = 1, t_hw = HW

    if HW <= 128 or full_slab <= data_budget:
        # Full contiguous (C2, HW) slab per batch row -> one long DMA each;
        # block over batch to amortize the ~0.35 us per-step overhead.
        t_hw = HW
        bn = max(1, min(N, data_budget // max(full_slab, 1)))
    else:
        # Largest lane-dense (multiple-of-128) H*W tile fitting the budget.
        bn = 1
        t_cap = max(128, (data_budget // per_col) // 128 * 128)
        t_hw = min((HW // 128) * 128, t_cap)

    # v7x megacore: make sure both TensorCores get at least one grid step.
    if force_two_steps and pl.cdiv(N, bn) * pl.cdiv(HW, t_hw) < 2:
        if N >= 2:
            bn = pl.cdiv(N, 2)
        elif HW > 128:
            t_hw = max(128, pl.cdiv(pl.cdiv(HW, 2), 128) * 128)
    return bn, t_hw


@functools.partial(jax.jit, donate_argnums=(0,))
def concat_residual(x_nchw, w_conv, b_conv):
    """x_nchw: (N, C, H, W) [DONATED -- callers who still need x must pass a copy];
    w_conv: (C/2, C/2, 1, 1); b_conv: (C/2,)."""
    N, C, H, W = x_nchw.shape
    C2 = C // 2
    assert C == 2 * C2, "channel dim must be even for chunk(2, dim=1)"
    HW = H * W
    itemsize = jnp.dtype(x_nchw.dtype).itemsize

    # ---- generation-aware VMEM budgeting -------------------------------
    physical_vmem = _vmem_capacity_bytes()
    if physical_vmem >= 100 * _MIB:        # v5e / v6e: 128 MiB VMEM, 1 TC/chip
        vmem_limit = 96 * _MIB
        data_budget = 56 * _MIB
        force_two_steps = False
    else:                                  # v7x: 64 MiB VMEM per TC, 2 TCs/chip
        vmem_limit = 32 * _MIB
        data_budget = 16 * _MIB
        force_two_steps = True
    # Subtract the (double-buffered) resident weight + bias tiles from the pool.
    # TODO(synk): could additionally mark them pipeline_mode=pl.Buffered(1)
    # (constant index_map -> no re-fetch) to halve that footprint.
    data_budget -= 2 * (C2 * C2 * itemsize + C2 * 4)
    data_budget = max(data_budget, 2 * _MIB)

    bn, t_hw = _choose_tiling(N, C2, HW, itemsize, data_budget, force_two_steps)
    grid = (pl.cdiv(N, bn), pl.cdiv(HW, t_hw))

    # Free (layout-preserving) views: NCHW -> (N, 2, C2, H*W); no transposes.
    x4 = x_nchw.reshape(N, 2, C2, HW)
    # bf16 activations -> bf16 weights (native MXU pass); accumulate in f32.
    w = w_conv.reshape(C2, C2).astype(x_nchw.dtype)
    b = b_conv.reshape(C2, 1).astype(jnp.float32)

    # Conv half only: element index 1 on the squeezed "half" axis.
    half_spec = pl.BlockSpec((bn, None, C2, t_hw), lambda n, j: (n, 1, 0, j))

    # Tiny contraction depth wastes the MXU (padded to 128/256) -> VPU MAC.
    use_mxu = C2 >= (8 if itemsize >= 4 else 16)
    kernel = _concat_residual_kernel_mxu if use_mxu else _concat_residual_kernel_vpu

    out4 = pl.pallas_call(
        kernel,
        out_shape=jax.ShapeDtypeStruct((N, 2, C2, HW), x_nchw.dtype),
        grid_spec=pltpu.PrefetchScalarGridSpec(
            num_scalar_prefetch=0,
            grid=grid,
            in_specs=[
                half_spec,                                     # x2 tile
                pl.BlockSpec((C2, C2), lambda n, j: (0, 0)),   # weight (resident)
                pl.BlockSpec((C2, 1), lambda n, j: (0, 0)),    # bias (resident)
            ],
            # Write ONLY the conv half; the x1 half of the aliased output buffer
            # is never read or written and keeps its input values.
            out_specs=half_spec,
        ),
        input_output_aliases={0: 0},
        compiler_params=pltpu.CompilerParams(
            dimension_semantics=("parallel", "parallel"),
            vmem_limit_bytes=vmem_limit,
        ),
    )(x4, w, b)

    return out4.reshape(N, C, H, W)


def _reference(x_nchw, w_conv, b_conv):
    N, C, H, W = x_nchw.shape
    C2 = C // 2
    x1 = x_nchw[:, :C2]
    x2 = x_nchw[:, C2:]
    out = (jnp.einsum("oi,nihw->nohw", w_conv.reshape(C2, C2), x2)
           + b_conv.reshape(1, C2, 1, 1))
    return jnp.concatenate([x1, out], axis=1)


def _run_case(key, N, C, H, W):
    kx, kw, kb = jax.random.split(key, 3)
    C2 = C // 2
    x = jax.random.normal(kx, (N, C, H, W), dtype=jnp.float32)
    w_conv = jax.random.normal(kw, (C2, C2, 1, 1), dtype=jnp.float32) * 0.1
    b_conv = jax.random.normal(kb, (C2,), dtype=jnp.float32) * 0.1

    # Compute the reference BEFORE the kernel call: concat_residual donates x.
    ref = jax.block_until_ready(_reference(x, w_conv, b_conv))
    out = jax.block_until_ready(concat_residual(x, w_conv, b_conv))

    assert out.shape == (N, C, H, W)
    assert jnp.allclose(out, ref, atol=1e-5, rtol=1e-5)


if __name__ == "__main__":
    key = jax.random.PRNGKey(0)
    k1, k2 = jax.random.split(key)

    # Small shape from the module spec (C2 = 2 -> tiny-C2 VPU path).
    _run_case(k1, N=2, C=4, H=16, W=16)
    # Slightly wider channels (C2 = 16 -> MXU path), still small.
    _run_case(k2, N=2, C=32, H=8, W=8)

    print("KERNEL_OK")
</pallas_src>

<mosaic_0001>
module attributes {stable_mosaic.version = 11 : i64} {
  func.func @_concat_residual_kernel_vpu(%arg0: i32, %arg1: i32, %arg2: memref<1x1x2x256xf32, #tpu.memory_space<vmem>>, %arg3: memref<2x2xf32, #tpu.memory_space<vmem>>, %arg4: memref<2x1xf32, #tpu.memory_space<vmem>>, %arg5: memref<1x1x2x256xf32, #tpu.memory_space<vmem>>) attributes {dimension_semantics = [#tpu.dimension_semantics<parallel>, #tpu.dimension_semantics<parallel>], iteration_bounds = array<i64: 2, 1>, scalar_prefetch = 0 : i64, scratch_operands = 0 : i64, tpu.core_type = #tpu.core_type<tc>, window_params = [{transform_indices = @transform_0, window_bounds = array<i64: 1, 1, 2, 256>}, {pipeline_mode = #tpu.pipeline_mode<synchronous>, transform_indices = @transform_1, window_bounds = array<i64: 2, 2>}, {pipeline_mode = #tpu.pipeline_mode<synchronous>, transform_indices = @transform_2, window_bounds = array<i64: 2, 1>}, {transform_indices = @transform_3, window_bounds = array<i64: 1, 1, 2, 256>}]} {
    %c0 = arith.constant 0 : index
    %c0_0 = arith.constant 0 : index
    %c0_1 = arith.constant 0 : index
    %c0_2 = arith.constant 0 : index
    %0 = vector.load %arg2[%c0, %c0_0, %c0_1, %c0_2] : memref<1x1x2x256xf32, #tpu.memory_space<vmem>>, vector<1x1x2x256xf32>
    %1 = vector.shape_cast %0 : vector<1x1x2x256xf32> to vector<1x2x256xf32>
    %c0_3 = arith.constant 0 : index
    %c0_4 = arith.constant 0 : index
    %2 = vector.load %arg3[%c0_3, %c0_4] : memref<2x2xf32, #tpu.memory_space<vmem>>, vector<2x2xf32>
    %c0_5 = arith.constant 0 : index
    %c0_6 = arith.constant 0 : index
    %3 = vector.load %arg4[%c0_5, %c0_6] : memref<2x1xf32, #tpu.memory_space<vmem>>, vector<2x1xf32>
    %cst = arith.constant 0.000000e+00 : f32
    %4 = vector.broadcast %cst : f32 to vector<1x2x256xf32>
    %5 = vector.extract_strided_slice %2 {offsets = [0, 0], sizes = [2, 1], strides = [1, 1]} : vector<2x2xf32> to vector<2x1xf32>
    %6 = vector.shape_cast %5 : vector<2x1xf32> to vector<1x2x1xf32>
    %7 = vector.extract_strided_slice %1 {offsets = [0, 0, 0], sizes = [1, 1, 256], strides = [1, 1, 1]} : vector<1x2x256xf32> to vector<1x1x256xf32>
    %8 = vector.broadcast %6 : vector<1x2x1xf32> to vector<1x2x256xf32>
    %9 = vector.broadcast %7 : vector<1x1x256xf32> to vector<1x2x256xf32>
    %10 = arith.mulf %8, %9 : vector<1x2x256xf32>
    %11 = arith.addf %4, %10 : vector<1x2x256xf32>
    %12 = vector.extract_strided_slice %2 {offsets = [0, 1], sizes = [2, 1], strides = [1, 1]} : vector<2x2xf32> to vector<2x1xf32>
    %13 = vector.shape_cast %12 : vector<2x1xf32> to vector<1x2x1xf32>
    %14 = vector.extract_strided_slice %1 {offsets = [0, 1, 0], sizes = [1, 1, 256], strides = [1, 1, 1]} : vector<1x2x256xf32> to vector<1x1x256xf32>
    %15 = vector.broadcast %13 : vector<1x2x1xf32> to vector<1x2x256xf32>
    %16 = vector.broadcast %14 : vector<1x1x256xf32> to vector<1x2x256xf32>
    %17 = arith.mulf %15, %16 : vector<1x2x256xf32>
    %18 = arith.addf %11, %17 : vector<1x2x256xf32>
    %19 = vector.shape_cast %3 : vector<2x1xf32> to vector<1x2x1xf32>
    %20 = vector.broadcast %19 : vector<1x2x1xf32> to vector<1x2x256xf32>
    %21 = arith.addf %18, %20 : vector<1x2x256xf32>
    %c0_7 = arith.constant 0 : index
    %c0_8 = arith.constant 0 : index
    %c0_9 = arith.constant 0 : index
    %c0_10 = arith.constant 0 : index
    %22 = vector.load %arg5[%c0_7, %c0_8, %c0_9, %c0_10] : memref<1x1x2x256xf32, #tpu.memory_space<vmem>>, vector<1x1x2x256xf32>
    %23 = vector.shape_cast %22 : vector<1x1x2x256xf32> to vector<1x2x256xf32>
    %24 = vector.shape_cast %21 : vector<1x2x256xf32> to vector<1x1x2x256xf32>
    tpu.vector_store %arg5[%c0_7, %c0_8, %c0_9, %c0_10], %24 {strides = array<i32>} : memref<1x1x2x256xf32, #tpu.memory_space<vmem>>, vector<1x1x2x256xf32>,
    return
  }
  func.func @transform_0(%arg0: i32, %arg1: i32) -> (i32, i32, i32, i32) {
    %c1_i32 = arith.constant 1 : i32
    %c0_i32 = arith.constant 0 : i32
    %c0_i32_0 = arith.constant 0 : i32
    return %arg0, %c1_i32, %c0_i32, %arg1 : i32, i32, i32, i32
  }
  func.func @transform_1(%arg0: i32, %arg1: i32) -> (i32, i32) {
    %c0_i32 = arith.constant 0 : i32
    %c0_i32_0 = arith.constant 0 : i32
    %c0_i32_1 = arith.constant 0 : i32
    return %c0_i32, %c0_i32_0 : i32, i32
  }
  func.func @transform_2(%arg0: i32, %arg1: i32) -> (i32, i32) {
    %c0_i32 = arith.constant 0 : i32
    %c0_i32_0 = arith.constant 0 : i32
    %c0_i32_1 = arith.constant 0 : i32
    return %c0_i32, %c0_i32_0 : i32, i32
  }
  func.func @transform_3(%arg0: i32, %arg1: i32) -> (i32, i32, i32, i32) {
    %c1_i32 = arith.constant 1 : i32
    %c0_i32 = arith.constant 0 : i32
    %c0_i32_0 = arith.constant 0 : i32
    return %arg0, %c1_i32, %c0_i32, %arg1 : i32, i32, i32, i32
  }
}

</mosaic_0001>

<bundles_post_ra>
// kernel: concat_residual.1
= control target key start
LH: loop header
LB: loop body
LE: loop exit
PB: predicated region body
PF: predicated region fallthrough
CT: control target
= control target key end

     0   :  { %s449_s12 = smov 0   ;;  %s451_s13 = smov 0   ;;  %s488_s0 = inlined_call_operand.vmem [shape: f32[2,2,2,256], index: 0, kind: input, shape index: {}, may-alias: {0,3}]   ;;  %s489_s1 = inlined_call_operand.vmem [shape: f32[2,2], index: 1, kind: input, shape index: {}]   ;;  %s490_s2 = inlined_call_operand.vmem [shape: f32[2,1], index: 2, kind: input, shape index: {}]   ;;  %s491_s3 = inlined_call_operand.vmem [shape: f32[2,2,2,256], index: 3, kind: output, shape index: {}, may-alias: {0,3}]  }
   0x1   :  { %s453_s14 = smov 0  }
   0x2 LB: > { %s25_s15 = sadd.s32 1, %s421_s13  ;;  %p362_p0 = scmp.ge.s32.totalorder %s425_s14, 1  ;;  %s425_s14 = sphi %s453_s14, %s13_s14   ;;  %s421_s13 = sphi %s451_s13, %s493_s13   ;;  %s417_s12 = sphi %s449_s12, %s492_s12  }
   0x3   : > { %p27_p1 = scmp.ge.s32.totalorder %s25_s15, 2  ;;  %p159_p2 = scmp.lt.s32.totalorder %s425_s14, 3 }
   0x5   : > { %s495_s15 = smov (%p27_p1, %s25_s15), 0  ;;  %p160_p3 = pnand %p362_p0, %p159_p2 }
   0x6   : > { %p194_p4 = scmp.lt.s32.totalorder (!%p160_p3), %s417_s12, 1 }
   0x7   : > { %163 = sbr.rel (%p160_p3) target bundleno = 148 (0x94), region = 32 }
   0xc   : > { %v216_v0 = vld [vmem:[%s489_s1] sm:$0x3]  ;;  %v427_v2 = vmov 0   ;;  %v428_v3 = vmov 1   ;;  %s497_s12 = smov (!%p194_p4, %s417_s12), 1  ;;  %vm258_vm0 = vcmask 1041408  }
   0xd   : > { %v217_v1 = vld [vmem:[%s490_s2] sm:$0x3]  ;;  %399 = vset.pattern.permute.xlu0 %v427_v2  ;;  %401 = vset.pattern.permute.xlu1 %v427_v2  ;;  %s371_s20 = sshll.u32 %s497_s12, 3 }
   0xe   : > { %220 = vperm.xlu0 %399, %v216_v0   ;;  %250 = vperm.xlu1 %401, %v217_v1   ;;  %s312_s23 = scalar_lea.vmem %s488_s0, %s371_s20  ;;  %s317_s26 = scalar_lea.vmem %s491_s3, %s371_s20 }
   0xf   : > { %v367_v4 = vld [vmem:[%s312_s23 + $0x4] sm:$0xf] }
  0x10   : > { %v224_v6 = vperm.slane %v367_v4, 0  ;;  %v225_v7 = vperm.slane %v367_v4, 2  ;;  %v238_v8 = vperm.slane %v367_v4, 1  ;;  %v239_v9 = vperm.slane %v367_v4, 3 }
  0x12   : > { %v228_v10 = vperm.slane %v224_v6, 0  ;;  %v229_v11 = vperm.slane %v225_v7, 0  ;;  %v242_v12 = vperm.slane %v238_v8, 1  ;;  %v243_v13 = vperm.slane %v239_v9, 1 }
  0x16   : > { %400 = vset.pattern.permute.xlu0 %v428_v3 }
  0x17   : > { %235 = vperm.xlu0 %400, %v216_v0  }
  0x1f   : > { %402 = vset.pattern.permute.xlu0 %v427_v2 }
  0x80   : > { %v221_v5 = vpop.permute.xlu0 %220  ;;  %v251_v19 = vpop.permute.xlu1 %250 }
  0x81   : > { %v230_v15 = vmul.f32 %v228_v10, %v221_v5  ;;  %v231_v16 = vmul.f32 %v229_v11, %v221_v5 }
  0x89   : > { %v236_v14 = vpop.permute.xlu0 %235 }
  0x8a   : > { %v244_v17 = vmul.f32 %v242_v12, %v236_v14  ;;  %v245_v18 = vmul.f32 %v243_v13, %v236_v14 }
  0x8c   : > { %v246_v20 = vadd.f32 %v244_v17, %v230_v15  ;;  %v247_v21 = vadd.f32 %v245_v18, %v231_v16 }
  0x8e   : > { %v254_v22 = vadd.f32 %v251_v19, %v247_v21  ;;  %v253_v23 = vadd.f32 %v251_v19, %v246_v20 }
  0x90   : > { %v257_v24 = vrot.slane %v254_v22, 6 }
  0x92   : > { %v259_v25 = vsel %vm258_vm0, %v253_v23, %v257_v24 }
  0x93   : > { %368 = vst [vmem:[%s317_s26 + $0x4] sm:$0xf] %v259_v25 }
  0x94 PF: > { %s13_s14 = sadd.s32 1, %s425_s14   ;;  %s492_s12 = smov %s421_s13 }
  0x95   : > { %p10_p5 = scmp.ge.s32.totalorder %s13_s14, 4   ;;  %s493_s13 = smov %s495_s15 }
  0x97   :  { %12 = sbr.rel (!%p10_p5) target bundleno = 2 (0x2), region = 62 }

</bundles_post_ra>
